<compile_context>
chip_gen: v7x
topology: tpu7x:2x2x1
jax: 0.10.0
libtpu: 0.0.40
codegen_flags: <defaults>
</compile_context>

<pallas_src>
import functools
import math

import jax
import jax.numpy as jnp
from jax.experimental import pallas as pl
from jax.experimental.pallas import tpu as pltpu


def _round_up(x, m):
    return ((x + m - 1) // m) * m


def _pad2d(x, rows, cols):
    return jnp.pad(x, ((0, rows - x.shape[0]), (0, cols - x.shape[1])))


# ---------------------------------------------------------------------------
# Kernel: single grid step over the whole (padded) batch
# ---------------------------------------------------------------------------
def predictor_kernel(comp_ref, adj_ref, pmean_ref,
                     w_gcn_ref, w_enc_ref, w_head_c_ref, w_head_p_ref, b_ref,
                     out_ref, *, inv_n_atoms):
    comp = comp_ref[...]                                     # (B, N, A_pad)
    adj = adj_ref[...]                                       # (B, N, N)

    # ---- GCN (exact Predictor.gcn) folded through the decoder's atom mean-pool:
    #   mean_n (adj @ (comp @ W_gcn))
    #     == ((sum_n adj[:,n,:])[:, :, None] * comp).sum(axis=1) @ W_gcn / N
    adj_colsum = jnp.sum(adj, axis=1)                        # (B, N)   column sums
    c_pre = jnp.sum(adj_colsum[:, :, None] * comp, axis=1)   # (B, A_pad)  VPU + XLU
    c_pool = jnp.dot(c_pre, w_gcn_ref[...],
                     preferred_element_type=jnp.float32) * inv_n_atoms

    # ---- encoder stand-in (linear); protein already mean-pooled host-side,
    #      b_enc pre-folded into the fused output bias.
    p_pool = jnp.dot(pmean_ref[...], w_enc_ref[...],
                     preferred_element_type=jnp.float32)     # (B, H_pad)

    # ---- two accumulating head dots (no concat temporary)
    logits = (jnp.dot(c_pool, w_head_c_ref[...], preferred_element_type=jnp.float32)
              + jnp.dot(p_pool, w_head_p_ref[...], preferred_element_type=jnp.float32)
              + b_ref[...])                                  # (B, O_pad)

    # ---- exact Predictor.forward epilogue: torch.sigmoid(out)
    out_ref[...] = jax.nn.sigmoid(logits)


# ---------------------------------------------------------------------------
# One-time weight preparation (hoisted out of the per-call path)
# ---------------------------------------------------------------------------
def prepare_params(params):
    f32 = jnp.float32
    w_gcn = params["w_gcn"].astype(f32)
    w_enc = params["w_enc"].astype(f32)
    b_enc = params["b_enc"].astype(f32)
    w_dec_c = params["w_dec_c"].astype(f32)
    w_dec_p = params["w_dec_p"].astype(f32)
    w_out_c = params["w_out_c"].astype(f32)
    w_out_p = params["w_out_p"].astype(f32)
    b_out = params["b_out"].astype(f32)

    A = w_gcn.shape[0]
    P, H = w_enc.shape
    O = b_out.shape[1]
    A_pad, P_pad, H_pad, O_pad = (_round_up(d, 128) for d in (A, P, H, O))

    # Fuse decoder projections with the head (mean-pool commutes with linear)
    # and fold the encoder bias all the way into the output bias.
    w_head_c = w_dec_c @ w_out_c                              # (A, O)
    w_head_p = w_dec_p @ w_out_p                              # (H, O)
    b_fused = b_out + b_enc @ w_head_p                        # (1, O)

    return {
        "w_gcn": _pad2d(w_gcn, A_pad, A_pad),
        "w_enc": _pad2d(w_enc, P_pad, H_pad),
        "w_head_c": _pad2d(w_head_c, A_pad, O_pad),
        "w_head_p": _pad2d(w_head_p, H_pad, O_pad),
        "b_fused": _pad2d(b_fused, 1, O_pad),
    }


# ---------------------------------------------------------------------------
# Per-call forward
# ---------------------------------------------------------------------------
@functools.partial(jax.jit, static_argnames=("out_dim",))
def predictor_forward(compound, adj, protein, prepared, *, out_dim):
    B, N, A = compound.shape
    _, _, P = protein.shape
    A_pad = prepared["w_gcn"].shape[0]
    P_pad, H_pad = prepared["w_enc"].shape
    O_pad = prepared["b_fused"].shape[1]
    B_pad = _round_up(B, 8)

    f32 = jnp.float32
    # Activation padding via jnp.pad; protein is mean-pooled over L here so
    # only a (B_pad, P_pad) slab crosses HBM->VMEM.
    comp_p = jnp.pad(compound.astype(f32), ((0, B_pad - B), (0, 0), (0, A_pad - A)))
    adj_p = jnp.pad(adj.astype(f32), ((0, B_pad - B), (0, 0), (0, 0)))
    p_mean = jnp.mean(protein.astype(f32), axis=1)            # (B, P)
    p_mean_p = jnp.pad(p_mean, ((0, B_pad - B), (0, P_pad - P)))

    kernel = functools.partial(predictor_kernel, inv_n_atoms=1.0 / N)

    in_specs = [
        pl.BlockSpec((B_pad, N, A_pad), lambda i: (0, 0, 0)),   # compound
        pl.BlockSpec((B_pad, N, N), lambda i: (0, 0, 0)),       # adj
        pl.BlockSpec((B_pad, P_pad), lambda i: (0, 0)),         # pooled protein
        pl.BlockSpec((A_pad, A_pad), lambda i: (0, 0)),         # gcn weight
        pl.BlockSpec((P_pad, H_pad), lambda i: (0, 0)),         # encoder weight
        pl.BlockSpec((A_pad, O_pad), lambda i: (0, 0)),         # fused head (compound)
        pl.BlockSpec((H_pad, O_pad), lambda i: (0, 0)),         # fused head (protein)
        pl.BlockSpec((1, O_pad), lambda i: (0, 0)),             # fused bias
    ]
    out_specs = pl.BlockSpec((B_pad, O_pad), lambda i: (0, 0))  # lane-dense slab
    out_shape = jax.ShapeDtypeStruct((B_pad, O_pad), f32)

    out_padded = pl.pallas_call(
        kernel,
        grid=(1,),                      # whole (toy-size) batch in one grid step
        # TODO(synk): for large B on v7x, split the grid over batch
        # (dimension_semantics=("parallel",)) so both TensorCores are used and
        # activation tiles pipeline while weights stay resident.
        in_specs=in_specs,
        out_specs=out_specs,
        out_shape=out_shape,
        compiler_params=pltpu.CompilerParams(
            dimension_semantics=("arbitrary",)),
    )(comp_p, adj_p, p_mean_p,
      prepared["w_gcn"], prepared["w_enc"],
      prepared["w_head_c"], prepared["w_head_p"], prepared["b_fused"])

    return out_padded[:B, :out_dim]


# ---------------------------------------------------------------------------
# Pure-JAX reference (unfolded stand-in semantics) for correctness checks
# ---------------------------------------------------------------------------
def reference_forward(compound, adj, protein, params):
    support = jnp.einsum("bna,ac->bnc", compound, params["w_gcn"])
    gcn_out = jnp.einsum("bnm,bmc->bnc", adj, support)
    enc = jnp.einsum("blp,ph->blh", protein, params["w_enc"]) + params["b_enc"]
    c_pool = jnp.mean(jnp.einsum("bna,ah->bnh", gcn_out, params["w_dec_c"]), axis=1)
    p_pool = jnp.mean(jnp.einsum("blh,hk->blk", enc, params["w_dec_p"]), axis=1)
    logits = c_pool @ params["w_out_c"] + p_pool @ params["w_out_p"] + params["b_out"]
    return jax.nn.sigmoid(logits)


def init_params(key, atom_dim, prot_dim, hid_dim, out_dim):
    ks = jax.random.split(key, 8)
    stdv = 1.0 / math.sqrt(atom_dim)   # matches Predictor.init_weight
    return {
        "w_gcn":   jax.random.uniform(ks[0], (atom_dim, atom_dim),
                                      minval=-stdv, maxval=stdv, dtype=jnp.float32),
        "w_enc":   0.1 * jax.random.normal(ks[1], (prot_dim, hid_dim), jnp.float32),
        "b_enc":   0.1 * jax.random.normal(ks[2], (1, hid_dim), jnp.float32),
        "w_dec_c": 0.1 * jax.random.normal(ks[3], (atom_dim, hid_dim), jnp.float32),
        "w_dec_p": 0.1 * jax.random.normal(ks[4], (hid_dim, hid_dim), jnp.float32),
        "w_out_c": 0.1 * jax.random.normal(ks[5], (hid_dim, out_dim), jnp.float32),
        "w_out_p": 0.1 * jax.random.normal(ks[6], (hid_dim, out_dim), jnp.float32),
        "b_out":   0.1 * jax.random.normal(ks[7], (1, out_dim), jnp.float32),
    }


if __name__ == "__main__":
    B, N_atoms, atom_dim = 2, 8, 34      # atom_dim=34 matches module default
    L_prot, prot_dim = 10, 16
    hid_dim, out_dim = 32, 2

    key = jax.random.PRNGKey(0)
    k_c, k_a, k_p, k_w = jax.random.split(key, 4)

    compound = jax.random.normal(k_c, (B, N_atoms, atom_dim), jnp.float32)
    adj = (jax.random.uniform(k_a, (B, N_atoms, N_atoms)) > 0.5).astype(jnp.float32)
    protein = jax.random.normal(k_p, (B, L_prot, prot_dim), jnp.float32)
    params = init_params(k_w, atom_dim, prot_dim, hid_dim, out_dim)

    prepared = prepare_params(params)            # one-time weight fusion/padding
    out = predictor_forward(compound, adj, protein, prepared, out_dim=out_dim)
    jax.block_until_ready(out)

    out_ref = reference_forward(compound, adj, protein, params)
    assert out.shape == (B, out_dim)
    assert jnp.allclose(out, out_ref, atol=1e-4, rtol=1e-4)

    print("KERNEL_OK")
</pallas_src>

<mosaic_0001>
module attributes {stable_mosaic.version = 11 : i64} {
  func.func @predictor_kernel(%arg0: i32, %arg1: memref<8x8x128xf32, #tpu.memory_space<vmem>>, %arg2: memref<8x8x8xf32, #tpu.memory_space<vmem>>, %arg3: memref<8x128xf32, #tpu.memory_space<vmem>>, %arg4: memref<128x128xf32, #tpu.memory_space<vmem>>, %arg5: memref<128x128xf32, #tpu.memory_space<vmem>>, %arg6: memref<128x128xf32, #tpu.memory_space<vmem>>, %arg7: memref<128x128xf32, #tpu.memory_space<vmem>>, %arg8: memref<1x128xf32, #tpu.memory_space<vmem>>, %arg9: memref<8x128xf32, #tpu.memory_space<vmem>>) attributes {dimension_semantics = [#tpu.dimension_semantics<arbitrary>], iteration_bounds = array<i64: 1>, scalar_prefetch = 0 : i64, scratch_operands = 0 : i64, tpu.core_type = #tpu.core_type<tc>, window_params = [{pipeline_mode = #tpu.pipeline_mode<synchronous>, transform_indices = @transform_0, window_bounds = array<i64: 8, 8, 128>}, {pipeline_mode = #tpu.pipeline_mode<synchronous>, transform_indices = @transform_1, window_bounds = array<i64: 8, 8, 8>}, {pipeline_mode = #tpu.pipeline_mode<synchronous>, transform_indices = @transform_2, window_bounds = array<i64: 8, 128>}, {pipeline_mode = #tpu.pipeline_mode<synchronous>, transform_indices = @transform_3, window_bounds = array<i64: 128, 128>}, {pipeline_mode = #tpu.pipeline_mode<synchronous>, transform_indices = @transform_4, window_bounds = array<i64: 128, 128>}, {pipeline_mode = #tpu.pipeline_mode<synchronous>, transform_indices = @transform_5, window_bounds = array<i64: 128, 128>}, {pipeline_mode = #tpu.pipeline_mode<synchronous>, transform_indices = @transform_6, window_bounds = array<i64: 128, 128>}, {pipeline_mode = #tpu.pipeline_mode<synchronous>, transform_indices = @transform_7, window_bounds = array<i64: 1, 128>}, {pipeline_mode = #tpu.pipeline_mode<synchronous>, transform_indices = @transform_8, window_bounds = array<i64: 8, 128>}]} {
    %c0 = arith.constant 0 : index
    %c0_0 = arith.constant 0 : index
    %c0_1 = arith.constant 0 : index
    %0 = vector.load %arg1[%c0, %c0_0, %c0_1] : memref<8x8x128xf32, #tpu.memory_space<vmem>>, vector<8x8x128xf32>
    %c0_2 = arith.constant 0 : index
    %c0_3 = arith.constant 0 : index
    %c0_4 = arith.constant 0 : index
    %1 = vector.load %arg2[%c0_2, %c0_3, %c0_4] : memref<8x8x8xf32, #tpu.memory_space<vmem>>, vector<8x8x8xf32>
    %cst = arith.constant dense<0.000000e+00> : vector<8x8xf32>
    %2 = vector.multi_reduction <add>, %1, %cst [1] : vector<8x8x8xf32> to vector<8x8xf32>
    %3 = vector.shape_cast %2 : vector<8x8xf32> to vector<8x8x1xf32>
    %4 = vector.broadcast %3 : vector<8x8x1xf32> to vector<8x8x128xf32>
    %5 = arith.mulf %4, %0 : vector<8x8x128xf32>
    %cst_5 = arith.constant dense<0.000000e+00> : vector<8x128xf32>
    %6 = vector.multi_reduction <add>, %5, %cst_5 [1] : vector<8x8x128xf32> to vector<8x128xf32>
    %c0_6 = arith.constant 0 : index
    %c0_7 = arith.constant 0 : index
    %7 = vector.load %arg4[%c0_6, %c0_7] : memref<128x128xf32, #tpu.memory_space<vmem>>, vector<128x128xf32>
    %cst_8 = arith.constant dense<0.000000e+00> : vector<8x128xf32>
    %8 = tpu.matmul %6, %7, %cst_8 {dimension_numbers = #tpu.dot_dimension_numbers<[1], [0], [0], [1], [0, 0, 1, 1], [], []>} : vector<8x128xf32>, vector<128x128xf32>, vector<8x128xf32> -> vector<8x128xf32>
    %cst_9 = arith.constant 1.250000e-01 : f32
    %9 = vector.broadcast %cst_9 : f32 to vector<8x128xf32>
    %10 = arith.mulf %8, %9 : vector<8x128xf32>
    %c0_10 = arith.constant 0 : index
    %c0_11 = arith.constant 0 : index
    %11 = vector.load %arg3[%c0_10, %c0_11] : memref<8x128xf32, #tpu.memory_space<vmem>>, vector<8x128xf32>
    %c0_12 = arith.constant 0 : index
    %c0_13 = arith.constant 0 : index
    %12 = vector.load %arg5[%c0_12, %c0_13] : memref<128x128xf32, #tpu.memory_space<vmem>>, vector<128x128xf32>
    %cst_14 = arith.constant dense<0.000000e+00> : vector<8x128xf32>
    %13 = tpu.matmul %11, %12, %cst_14 {dimension_numbers = #tpu.dot_dimension_numbers<[1], [0], [0], [1], [0, 0, 1, 1], [], []>} : vector<8x128xf32>, vector<128x128xf32>, vector<8x128xf32> -> vector<8x128xf32>
    %c0_15 = arith.constant 0 : index
    %c0_16 = arith.constant 0 : index
    %14 = vector.load %arg6[%c0_15, %c0_16] : memref<128x128xf32, #tpu.memory_space<vmem>>, vector<128x128xf32>
    %cst_17 = arith.constant dense<0.000000e+00> : vector<8x128xf32>
    %15 = tpu.matmul %10, %14, %cst_17 {dimension_numbers = #tpu.dot_dimension_numbers<[1], [0], [0], [1], [0, 0, 1, 1], [], []>} : vector<8x128xf32>, vector<128x128xf32>, vector<8x128xf32> -> vector<8x128xf32>
    %c0_18 = arith.constant 0 : index
    %c0_19 = arith.constant 0 : index
    %16 = vector.load %arg7[%c0_18, %c0_19] : memref<128x128xf32, #tpu.memory_space<vmem>>, vector<128x128xf32>
    %cst_20 = arith.constant dense<0.000000e+00> : vector<8x128xf32>
    %17 = tpu.matmul %13, %16, %cst_20 {dimension_numbers = #tpu.dot_dimension_numbers<[1], [0], [0], [1], [0, 0, 1, 1], [], []>} : vector<8x128xf32>, vector<128x128xf32>, vector<8x128xf32> -> vector<8x128xf32>
    %18 = arith.addf %15, %17 : vector<8x128xf32>
    %c0_21 = arith.constant 0 : index
    %c0_22 = arith.constant 0 : index
    %19 = vector.load %arg8[%c0_21, %c0_22] : memref<1x128xf32, #tpu.memory_space<vmem>>, vector<1x128xf32>
    %20 = vector.broadcast %19 : vector<1x128xf32> to vector<8x128xf32>
    %21 = arith.addf %18, %20 : vector<8x128xf32>
    %22 = arith.negf %21 : vector<8x128xf32>
    %23 = math.exp %22 : vector<8x128xf32>
    %cst_23 = arith.constant 1.000000e+00 : f32
    %24 = vector.broadcast %cst_23 : f32 to vector<8x128xf32>
    %25 = arith.addf %24, %23 : vector<8x128xf32>
    %26 = arith.divf %24, %25 : vector<8x128xf32>
    %c0_24 = arith.constant 0 : index
    %c0_25 = arith.constant 0 : index
    %27 = vector.load %arg9[%c0_24, %c0_25] : memref<8x128xf32, #tpu.memory_space<vmem>>, vector<8x128xf32>
    tpu.vector_store %arg9[%c0_24, %c0_25], %26 {strides = array<i32>} : memref<8x128xf32, #tpu.memory_space<vmem>>, vector<8x128xf32>,
    return
  }
  func.func @transform_0(%arg0: i32) -> (i32, i32, i32) {
    %c0_i32 = arith.constant 0 : i32
    %c0_i32_0 = arith.constant 0 : i32
    %c0_i32_1 = arith.constant 0 : i32
    %c0_i32_2 = arith.constant 0 : i32
    return %c0_i32, %c0_i32_0, %c0_i32_1 : i32, i32, i32
  }
  func.func @transform_1(%arg0: i32) -> (i32, i32, i32) {
    %c0_i32 = arith.constant 0 : i32
    %c0_i32_0 = arith.constant 0 : i32
    %c0_i32_1 = arith.constant 0 : i32
    %c0_i32_2 = arith.constant 0 : i32
    return %c0_i32, %c0_i32_0, %c0_i32_1 : i32, i32, i32
  }
  func.func @transform_2(%arg0: i32) -> (i32, i32) {
    %c0_i32 = arith.constant 0 : i32
    %c0_i32_0 = arith.constant 0 : i32
    %c0_i32_1 = arith.constant 0 : i32
    return %c0_i32, %c0_i32_0 : i32, i32
  }
  func.func @transform_3(%arg0: i32) -> (i32, i32) {
    %c0_i32 = arith.constant 0 : i32
    %c0_i32_0 = arith.constant 0 : i32
    %c0_i32_1 = arith.constant 0 : i32
    return %c0_i32, %c0_i32_0 : i32, i32
  }
  func.func @transform_4(%arg0: i32) -> (i32, i32) {
    %c0_i32 = arith.constant 0 : i32
    %c0_i32_0 = arith.constant 0 : i32
    %c0_i32_1 = arith.constant 0 : i32
    return %c0_i32, %c0_i32_0 : i32, i32
  }
  func.func @transform_5(%arg0: i32) -> (i32, i32) {
    %c0_i32 = arith.constant 0 : i32
    %c0_i32_0 = arith.constant 0 : i32
    %c0_i32_1 = arith.constant 0 : i32
    return %c0_i32, %c0_i32_0 : i32, i32
  }
  func.func @transform_6(%arg0: i32) -> (i32, i32) {
    %c0_i32 = arith.constant 0 : i32
    %c0_i32_0 = arith.constant 0 : i32
    %c0_i32_1 = arith.constant 0 : i32
    return %c0_i32, %c0_i32_0 : i32, i32
  }
  func.func @transform_7(%arg0: i32) -> (i32, i32) {
    %c0_i32 = arith.constant 0 : i32
    %c0_i32_0 = arith.constant 0 : i32
    %c0_i32_1 = arith.constant 0 : i32
    return %c0_i32, %c0_i32_0 : i32, i32
  }
  func.func @transform_8(%arg0: i32) -> (i32, i32) {
    %c0_i32 = arith.constant 0 : i32
    %c0_i32_0 = arith.constant 0 : i32
    %c0_i32_1 = arith.constant 0 : i32
    return %c0_i32, %c0_i32_0 : i32, i32
  }
}

</mosaic_0001>

<bundles_post_ra>
// kernel: predictor_forward.1
= control target key start
LH: loop header
LB: loop body
LE: loop exit
PB: predicated region body
PF: predicated region fallthrough
CT: control target
= control target key end

     0   :  { %13 = vsyncpa [#allocation3], 0  ;;  %s1259_s0 = inlined_call_operand.vmem [shape: f32[8,8,128], index: 0, kind: input, shape index: {}]   ;;  %s1260_s1 = inlined_call_operand.vmem [shape: f32[8,8,8], index: 1, kind: input, shape index: {}]   ;;  %s1261_s2 = inlined_call_operand.vmem [shape: f32[8,128], index: 2, kind: input, shape index: {}]   ;;  %s1262_s3 = inlined_call_operand.vmem [shape: f32[128,128], index: 3, kind: input, shape index: {}]   ;;  %s1263_s4 = inlined_call_operand.hbm [shape: f32[128,128], index: 4, kind: input, shape index: {}]   ;;  %s1264_s5 = inlined_call_operand.hbm [shape: f32[128,128], index: 5, kind: input, shape index: {}]   ;;  %s1265_s6 = inlined_call_operand.hbm [shape: f32[128,128], index: 6, kind: input, shape index: {}]   ;;  %s1266_s7 = inlined_call_operand.vmem [shape: f32[1,128], index: 7, kind: input, shape index: {}]   ;;  %s1267_s8 = inlined_call_operand.vmem [shape: f32[8,128], index: 8, kind: output, shape index: {}]  }
   0x1   :  { %14 = vsyncpa [#allocation5], 0  ;;  %s1001_s27 = smov [#allocation4]   ;;  %s1002_s29 = smov [#allocation2]  }
   0x2   :  { %s40_s28 = sshll.u32 %s1001_s27, 4  ;;  %s28_s30 = sshll.u32 %s1002_s29, 4  ;;  %s41_s28 = int_to_ptr.vmem [resolvable:$true] %s40_s28  ;;  %s1054_s30 = int_to_ptr.vmem [resolvable:$true] %s28_s30 }
   0x3   :  { %s931_s11 = scalar_lea.hbm %s1264_s5, 2048 }
   0x4   :  { %p932_p0 = scmp.ne.s32.totalorder %s1264_s5, %s931_s11  ;;  %p935_p1 = scmp.lt.u32.totalorder %s931_s11, %s1264_s5 }
   0x6   :  { %p937_p2 = pnand %p935_p1, %p932_p0 }
   0x8   :  { %940 = shalt.err (!%p937_p2)
}
   0x9   :  { %s941_s16 = scalar_lea.vmem %s41_s28, 2048  ;;  %p946_p4 = scmp.lt.s32.totalorder %s41_s28, %s41_s28 }
   0xa   :  { %p942_p3 = scmp.ne.s32.totalorder %s41_s28, %s941_s16  ;;  %p947_p5 = scmp.lt.s32.totalorder %s941_s16, %s941_s16 }
   0xc   :  { %p948_p6 = por %p947_p5, %p946_p4 }
   0xe   :  { %p949_p7 = pnand %p948_p6, %p942_p3 }
  0x10   :  { %952 = shalt.err (!%p949_p7)
}
  0x11   :  { %s1003_s17 = smov 128   ;;  %s1004_s18 = smov 8  }
  0x12   :  { %46 = dma.hbm_to_vmem [thread:$0]  %s1264_s5, 2048, %s41_s28, [#allocation5], %s1003_s17, %s1003_s17, %s1004_s18  }
  0x13   :  { %s953_s23 = scalar_lea.hbm %s1263_s4, 2048 }
  0x14   :  { %p954_p8 = scmp.ne.s32.totalorder %s1263_s4, %s953_s23  ;;  %p957_p9 = scmp.lt.u32.totalorder %s953_s23, %s1263_s4 }
  0x16   :  { %p959_p10 = pnand %p957_p9, %p954_p8 }
  0x18   :  { %962 = shalt.err (!%p959_p10)
}
  0x19   :  { %s963_s29 = scalar_lea.vmem %s1054_s30, 2048  ;;  %p968_p12 = scmp.lt.s32.totalorder %s1054_s30, %s1054_s30 }
  0x1a   :  { %p964_p11 = scmp.ne.s32.totalorder %s1054_s30, %s963_s29  ;;  %p969_p13 = scmp.lt.s32.totalorder %s963_s29, %s963_s29 }
  0x1c   :  { %p970_p0 = por %p969_p13, %p968_p12 }
  0x1e   :  { %p971_p1 = pnand %p970_p0, %p964_p11 }
  0x20   :  { %974 = shalt.err (!%p971_p1)
}
  0x21   :  { %34 = dma.hbm_to_vmem [thread:$0]  %s1263_s4, 2048, %s1054_s30, [#allocation3], %s1003_s17, %s1003_s17, %s1004_s18  }
  0x22   :  { %s1005_s9 = smov [#allocation6]   ;;  %s975_s13 = scalar_lea.hbm %s1265_s6, 2048 }
  0x23   :  { %s52_s10 = sshll.u32 %s1005_s9, 4  ;;  %p976_p2 = scmp.ne.s32.totalorder %s1265_s6, %s975_s13  ;;  %s53_s10 = int_to_ptr.vmem [resolvable:$true] %s52_s10 }
  0x24   :  { %p979_p3 = scmp.lt.u32.totalorder %s975_s13, %s1265_s6 }
  0x26   :  { %p981_p4 = pnand %p979_p3, %p976_p2 }
  0x28   :  { %984 = shalt.err (!%p981_p4)
}
  0x29   :  { %s985_s20 = scalar_lea.vmem %s53_s10, 2048  ;;  %p990_p6 = scmp.lt.s32.totalorder %s53_s10, %s53_s10 }
  0x2a   :  { %p986_p5 = scmp.ne.s32.totalorder %s53_s10, %s985_s20  ;;  %p991_p7 = scmp.lt.s32.totalorder %s985_s20, %s985_s20 }
  0x2c   :  { %p992_p8 = por %p991_p7, %p990_p6 }
  0x2e   :  { %p993_p9 = pnand %p992_p8, %p986_p5 }
  0x30   :  { %996 = shalt.err (!%p993_p9)
}
  0x31   :  { %58 = dma.hbm_to_vmem [thread:$0]  %s1265_s6, 2048, %s53_s10, [#allocation5], %s1003_s17, %s1003_s17, %s1004_s18  }
  0x32   :  { %997 = dma.done.wait [#allocation3], 2048  }
  0x33   :  { %998 = vsyncadd [#allocation3], 4294965248 }
  0x34   :  { %999 = dma.done.wait [#allocation5], 4096  }
  0x35   :  { %1000 = vsyncadd [#allocation5], 4294963200  ;;  %v1006_v0 = vmov 0.0|0.0   ;;  %vm86_vm0 = vcmask 64512   ;;  %v80_v1 = vld [vmem:[%s1260_s1 + $0x10] sm:$0xff]  ;;  %v78_v2 = vld [vmem:[%s1260_s1] sm:$0xff] }
  0x36   :  { %823 = vmatprep.subr.bf16.mxu0 %v1006_v0  ;;  %847 = vmatprep.subr.bf16.mxu1 %v1006_v0  ;;  %v81_v3 = vld [vmem:[%s1260_s1 + $0x18] sm:$0xff]  ;;  %v101_v4 = vsel %vm86_vm0, %v80_v1, 0.0  ;;  %v87_v5 = vsel %vm86_vm0, %v78_v2, 0.0  ;;  %v79_v7 = vld [vmem:[%s1260_s1 + $0x8] sm:$0xff]  ;;  %v82_v9 = vld [vmem:[%s1260_s1 + $0x20] sm:$0xff]  ;;  %vm1007_vm1 = vmmov 0  }
  0x37   :  { %v108_v6 = vsel %vm86_vm0, %v81_v3, 0.0  ;;  %v83_v8 = vld [vmem:[%s1260_s1 + $0x28] sm:$0xff]  ;;  %v102_v10 = vrot.slane %v101_v4, 4  ;;  %v88_v11 = vrot.slane %v87_v5, 4  ;;  %v94_v13 = vsel %vm86_vm0, %v79_v7, 0.0  ;;  %v85_v14 = vld [vmem:[%s1260_s1 + $0x38] sm:$0xff] }
  0x38   :  { %v109_v12 = vrot.slane %v108_v6, 4  ;;  %v84_v15 = vld [vmem:[%s1260_s1 + $0x30] sm:$0xff]  ;;  %v95_v16 = vrot.slane %v94_v13, 4  ;;  %v122_v17 = vsel %vm86_vm0, %v83_v8, 0.0  ;;  %v115_v18 = vsel %vm86_vm0, %v82_v9, 0.0  ;;  %v223_v48 = vld [vmem:[%s1262_s3] sm:$0xff] }
  0x39   :  { %v136_v19 = vsel %vm86_vm0, %v85_v14, 0.0  ;;  %v103_v20 = vadd.f32 %v102_v10, %v101_v4  ;;  %v89_v21 = vadd.f32 %v88_v11, %v87_v5  ;;  %v123_v23 = vrot.slane %v122_v17, 4  ;;  %v224_v52 = vld [vmem:[%s1262_s3 + $0x8] sm:$0xff]  ;;  %v334_v53 = vld [vmem:[#allocation2] sm:$0xff]  ;;  %v225_v57 = vld [vmem:[%s1262_s3 + $0x10] sm:$0xff] }
  0x3a   :  { %v110_v22 = vadd.f32 %v109_v12, %v108_v6  ;;  %v96_v24 = vadd.f32 %v95_v16, %v94_v13  ;;  %v116_v25 = vrot.slane %v115_v18, 4  ;;  %v137_v26 = vrot.slane %v136_v19, 4  ;;  %v335_v54 = vld [vmem:[#allocation2 + $0x8] sm:$0xff]  ;;  %v226_v62 = vld [vmem:[%s1262_s3 + $0x18] sm:$0xff]  ;;  %v336_v63 = vld [vmem:[#allocation2 + $0x10] sm:$0xff] }
  0x3b   :  { %v129_v27 = vsel %vm86_vm0, %v84_v15, 0.0  ;;  %v104_v28 = vrot.slane %v103_v20, 2  ;;  %v90_v29 = vrot.slane %v89_v21, 2  ;;  %v124_v31 = vadd.f32 %v123_v23, %v122_v17  ;;  %v337_v1 = vld [vmem:[#allocation2 + $0x18] sm:$0xff]  ;;  %v227_v8 = vld [vmem:[%s1262_s3 + $0x20] sm:$0xff]  ;;  %v228_v9 = vld [vmem:[%s1262_s3 + $0x28] sm:$0xff] }
  0x3c   :  { %v111_v30 = vrot.slane %v110_v22, 2  ;;  %v97_v32 = vrot.slane %v96_v24, 2  ;;  %v117_v33 = vadd.f32 %v116_v25, %v115_v18  ;;  %v138_v34 = vadd.f32 %v137_v26, %v136_v19  ;;  %v338_v10 = vld [vmem:[#allocation2 + $0x20] sm:$0xff]  ;;  %v339_v11 = vld [vmem:[#allocation2 + $0x28] sm:$0xff]  ;;  %v229_v18 = vld [vmem:[%s1262_s3 + $0x30] sm:$0xff] }
  0x3d   :  { %v130_v35 = vrot.slane %v129_v27, 4  ;;  %v105_v36 = vadd.f32 %v104_v28, %v103_v20  ;;  %v91_v37 = vadd.f32 %v90_v29, %v89_v21  ;;  %v125_v39 = vrot.slane %v124_v31, 2  ;;  %v230_v19 = vld [vmem:[%s1262_s3 + $0x38] sm:$0xff]  ;;  %v340_v20 = vld [vmem:[#allocation2 + $0x30] sm:$0xff]  ;;  %v231_v26 = vld [vmem:[%s1262_s3 + $0x40] sm:$0xff] }
  0x3e   :  { %v112_v38 = vadd.f32 %v111_v30, %v110_v22  ;;  %v98_v40 = vadd.f32 %v97_v32, %v96_v24  ;;  %v118_v41 = vrot.slane %v117_v33, 2  ;;  %v139_v42 = vrot.slane %v138_v34, 2  ;;  %v341_v21 = vld [vmem:[#allocation2 + $0x38] sm:$0xff]  ;;  %v342_v28 = vld [vmem:[#allocation2 + $0x40] sm:$0xff]  ;;  %v343_v29 = vld [vmem:[#allocation2 + $0x48] sm:$0xff] }
  0x3f   :  { %v131_v43 = vadd.f32 %v130_v35, %v129_v27  ;;  %v106_v44 = vrot.slane %v105_v36, 1  ;;  %v92_v45 = vrot.slane %v91_v37, 1  ;;  %v126_v47 = vadd.f32 %v125_v39, %v124_v31  ;;  %v232_v27 = vld [vmem:[%s1262_s3 + $0x48] sm:$0xff]  ;;  %v344_v35 = vld [vmem:[#allocation2 + $0x50] sm:$0xff]  ;;  %v235_v39 = vld [vmem:[%s1262_s3 + $0x60] sm:$0xff] }
  0x40   :  { %v113_v46 = vrot.slane %v112_v38, 1  ;;  %v99_v49 = vrot.slane %v98_v40, 1  ;;  %v119_v50 = vadd.f32 %v118_v41, %v117_v33  ;;  %v140_v61 = vadd.f32 %v139_v42, %v138_v34  ;;  %v233_v33 = vld [vmem:[%s1262_s3 + $0x50] sm:$0xff]  ;;  %v234_v34 = vld [vmem:[%s1262_s3 + $0x58] sm:$0xff]  ;;  %v346_v41 = vld [vmem:[#allocation2 + $0x60] sm:$0xff] }
  0x41   :  { %v132_v51 = vrot.slane %v131_v43, 2  ;;  %v107_v55 = vadd.f32 %v106_v44, %v105_v36  ;;  %v93_v56 = vadd.f32 %v92_v45, %v91_v37  ;;  %v127_v60 = vrot.slane %v126_v47, 1  ;;  %v345_v36 = vld [vmem:[#allocation2 + $0x58] sm:$0xff]  ;;  %v347_v42 = vld [vmem:[#allocation2 + $0x68] sm:$0xff]  ;;  %v237_v45 = vld [vmem:[%s1262_s3 + $0x70] sm:$0xff] }
  0x42   :  { %v114_v58 = vadd.f32 %v113_v46, %v112_v38  ;;  %v100_v59 = vadd.f32 %v99_v49, %v98_v40  ;;  %v120_v2 = vrot.slane %v119_v50, 1  ;;  %v824_v4 = vpack.c.bf16 %v224_v52, %v223_v48  ;;  %v236_v40 = vld [vmem:[%s1262_s3 + $0x68] sm:$0xff]  ;;  %v238_v46 = vld [vmem:[%s1262_s3 + $0x78] sm:$0xff] }
  0x43   :  { %150 = vbcast.lane.b32.xlu1 %v107_v55, 256  ;;  %144 = vbcast.lane.b32.xlu0 %v93_v56, 256  ;;  %v133_v3 = vadd.f32 %v132_v51, %v131_v43  ;;  %v848_v5 = vpack.c.bf16 %v335_v54, %v334_v53  ;;  %v827_v6 = vpack.c.bf16 %v226_v62, %v225_v57  ;;  %v141_v14 = vrot.slane %v140_v61, 1  ;;  %v349_v48 = vld [vmem:[#allocation2 + $0x78] sm:$0xff]  ;;  %v420_v51 = vld [vmem:[#allocation4] sm:$0xff]  ;;  %v421_v52 = vld [vmem:[#allocation4 + $0x8] sm:$0xff] }
  0x44   :  { %825 = vmatpush3.bf16.msra.mxu0 %v824_v4  ;;  %v851_v7 = vpack.c.bf16 %v337_v1, %v336_v63  ;;  %v128_v12 = vadd.f32 %v127_v60, %v126_v47  ;;  %v121_v13 = vadd.f32 %v120_v2, %v119_v50  ;;  %v830_v16 = vpack.c.bf16 %v228_v9, %v227_v8  ;;  %v348_v47 = vld [vmem:[#allocation2 + $0x70] sm:$0xff]  ;;  %v333_v53 = vld [vmem:[%s1261_s2] sm:$0xff]  ;;  %v423_v56 = vld [vmem:[#allocation4 + $0x18] sm:$0xff] }
  0x45   :  { %849 = vmatpush3.bf16.msra.mxu1 %v848_v5  ;;  %826 = vmatprep.subr.bf16.mxu0 %v1006_v0  ;;  %v134_v15 = vrot.slane %v133_v3, 1  ;;  %v854_v17 = vpack.c.bf16 %v339_v11, %v338_v10  ;;  %v142_v22 = vadd.f32 %v141_v14, %v140_v61  ;;  %v833_v24 = vpack.c.bf16 %v230_v19, %v229_v18  ;;  %v422_v55 = vld [vmem:[#allocation4 + $0x10] sm:$0xff]  ;;  %v427_v62 = vld [vmem:[#allocation4 + $0x38] sm:$0xff]  ;;  %v428_v1 = vld [vmem:[#allocation4 + $0x40] sm:$0xff] }
  0x46   :  { %850 = vmatprep.subr.bf16.mxu1 %v1006_v0  ;;  %v857_v25 = vpack.c.bf16 %v341_v21, %v340_v20  ;;  %v1008_v30 = vmov 0.0   ;;  %v836_v31 = vpack.c.bf16 %v232_v27, %v231_v26  ;;  %v860_v32 = vpack.c.bf16 %v343_v29, %v342_v28  ;;  %v426_v61 = vld [vmem:[#allocation4 + $0x30] sm:$0xff]  ;;  %v429_v2 = vld [vmem:[#allocation4 + $0x48] sm:$0xff]  ;;  %v431_v5 = vld [vmem:[#allocation4 + $0x58] sm:$0xff] }
  0x47   :  { %153 = vbcast.lane.b32.xlu1 %v114_v58, 256  ;;  %147 = vbcast.lane.b32.xlu0 %v100_v59, 256  ;;  %v135_v23 = vadd.f32 %v134_v15, %v133_v3  ;;  %v839_v37 = vpack.c.bf16 %v234_v34, %v233_v33  ;;  %v863_v38 = vpack.c.bf16 %v345_v36, %v344_v35  ;;  %v424_v58 = vld [vmem:[#allocation4 + $0x20] sm:$0xff]  ;;  %v425_v59 = vld [vmem:[#allocation4 + $0x28] sm:$0xff]  ;;  %v430_v4 = vld [vmem:[#allocation4 + $0x50] sm:$0xff]  ;;  %vm247_vm2 = vcmask 1041409  }
  0x48   :  { %828 = vmatpush3.bf16.msra.mxu0 %v827_v6  ;;  %715 = vmatprep.mubr.msk.f32.mxu0 %vm1007_vm1, %v1008_v30  ;;  %v842_v43 = vpack.c.bf16 %v236_v40, %v235_v39  ;;  %v866_v44 = vpack.c.bf16 %v347_v42, %v346_v41  ;;  %v845_v49 = vpack.c.bf16 %v238_v46, %v237_v45  ;;  %v433_v8 = vld [vmem:[#allocation4 + $0x68] sm:$0xff]  ;;  %v72_v10 = vld [vmem:[%s1259_s0 + $0x10] sm:$0xff]  ;;  %v70_v11 = vld [vmem:[%s1259_s0] sm:$0xff]  ;;  %vm249_vm3 = vcmask 1042434  }
  0x49   :  { %852 = vmatpush3.bf16.msra.mxu1 %v851_v7  ;;  %829 = vmatprep.subr.bf16.mxu0 %v1006_v0  ;;  %v869_v50 = vpack.c.bf16 %v349_v48, %v348_v47  ;;  %v896_v54 = vpack.c.bf16 %v421_v52, %v420_v51  ;;  %v899_v57 = vpack.c.bf16 %v423_v56, %v422_v55  ;;  %v432_v7 = vld [vmem:[#allocation4 + $0x60] sm:$0xff]  ;;  %vm251_vm4 = vcmask 1043459  }
  0x4a   :  { %853 = vmatprep.subr.bf16.mxu1 %v1006_v0  ;;  %750 = vmatprep.mubr.msk.f32.mxu1 %vm1007_vm1, %v1008_v30  ;;  %v902_v60 = vpack.c.bf16 %v425_v59, %v424_v58  ;;  %v905_v63 = vpack.c.bf16 %v427_v62, %v426_v61  ;;  %v908_v3 = vpack.c.bf16 %v429_v2, %v428_v1  ;;  %vm253_vm5 = vcmask 1044484  }
  0x4b   :  { %159 = vbcast.lane.b32.xlu1 %v128_v12, 256  ;;  %156 = vbcast.lane.b32.xlu0 %v121_v13, 256  ;;  %v911_v6 = vpack.c.bf16 %v431_v5, %v430_v4  ;;  %v914_v9 = vpack.c.bf16 %v433_v8, %v432_v7  ;;  %vm255_vm6 = vcmask 1045509   ;;  %vm257_vm7 = vcmask 1046534  }
  0x4c   :  { %831 = vmatpush3.bf16.msra.mxu0 %v830_v16  ;;  %v73_v16 = vld [vmem:[%s1259_s0 + $0x18] sm:$0xff]  ;;  %vm259_vm8 = vcmask 1047559  }
  0x4d   :  { %855 = vmatpush3.bf16.msra.mxu1 %v854_v17  ;;  %832 = vmatprep.subr.bf16.mxu0 %v1006_v0  ;;  %v71_v17 = vld [vmem:[%s1259_s0 + $0x8] sm:$0xff] }
  0x4e   :  { %856 = vmatprep.subr.bf16.mxu1 %v1006_v0 }
  0x4f   :  { %165 = vbcast.lane.b32.xlu1 %v142_v22, 256  ;;  %162 = vbcast.lane.b32.xlu0 %v135_v23, 256 }
  0x50   :  { %834 = vmatpush3.bf16.msra.mxu0 %v833_v24 }
  0x51   :  { %858 = vmatpush3.bf16.msra.mxu1 %v857_v25  ;;  %835 = vmatprep.subr.bf16.mxu0 %v1006_v0 }
  0x52   :  { %859 = vmatprep.subr.bf16.mxu1 %v1006_v0 }
  0x54   :  { %837 = vmatpush3.bf16.msra.mxu0 %v836_v31  ;;  %v75_v31 = vld [vmem:[%s1259_s0 + $0x28] sm:$0xff] }
  0x55   :  { %861 = vmatpush3.bf16.msra.mxu1 %v860_v32  ;;  %838 = vmatprep.subr.bf16.mxu0 %v1006_v0  ;;  %v74_v32 = vld [vmem:[%s1259_s0 + $0x20] sm:$0xff] }
  0x56   :  { %862 = vmatprep.subr.bf16.mxu1 %v1006_v0 }
  0x58   :  { %840 = vmatpush3.bf16.msra.mxu0 %v839_v37 }
  0x59   :  { %864 = vmatpush3.bf16.msra.mxu1 %v863_v38  ;;  %841 = vmatprep.subr.bf16.mxu0 %v1006_v0 }
  0x5a   :  { %865 = vmatprep.subr.bf16.mxu1 %v1006_v0 }
  0x5c   :  { %843 = vmatpush3.bf16.msra.mxu0 %v842_v43  ;;  %v77_v43 = vld [vmem:[%s1259_s0 + $0x38] sm:$0xff] }
  0x5d   :  { %867 = vmatpush3.bf16.msra.mxu1 %v866_v44  ;;  %844 = vmatprep.subr.bf16.mxu0 %v1006_v0  ;;  %v76_v44 = vld [vmem:[%s1259_s0 + $0x30] sm:$0xff] }
  0x5e   :  { %868 = vmatprep.subr.bf16.mxu1 %v1006_v0 }
  0x60   :  { %846 = vmatpush3.bf16.msra.mxu0 %v845_v49 }
  0x61   :  { %870 = vmatpush3.bf16.msra.mxu1 %v869_v50  ;;  %871 = vmatprep.subr.bf16.mxu0 %v1006_v0 }
  0x62   :  { %895 = vmatprep.subr.bf16.mxu1 %v1006_v0 }
  0x64   :  { %751 = vmatmul.mubr.f32.vlgmr.msra.gmra.mrb[0].mxu1 %v333_v53 }
  0x65   :  { %897 = vmatpush3.bf16.msra.mxu1 %v896_v54  ;;  %820 = vmatprep.mubr.msk.f32.mxu1 %vm1007_vm1, %v1008_v30 }
  0x66   :  { %898 = vmatprep.subr.bf16.mxu1 %v1006_v0 }
  0x69   :  { %900 = vmatpush3.bf16.msra.mxu1 %v899_v57 }
  0x6a   :  { %901 = vmatprep.subr.bf16.mxu1 %v1006_v0 }
  0x6d   :  { %903 = vmatpush3.bf16.msra.mxu1 %v902_v60 }
  0x6e   :  { %904 = vmatprep.subr.bf16.mxu1 %v1006_v0 }
  0x71   :  { %906 = vmatpush3.bf16.msra.mxu1 %v905_v63 }
  0x72   :  { %907 = vmatprep.subr.bf16.mxu1 %v1006_v0 }
  0x75   :  { %909 = vmatpush3.bf16.msra.mxu1 %v908_v3 }
  0x76   :  { %910 = vmatprep.subr.bf16.mxu1 %v1006_v0 }
  0x79   :  { %912 = vmatpush3.bf16.msra.mxu1 %v911_v6 }
  0x7a   :  { %913 = vmatprep.subr.bf16.mxu1 %v1006_v0 }
  0x7d   :  { %915 = vmatpush3.bf16.msra.mxu1 %v914_v9 }
  0x7e   :  { %916 = vmatprep.subr.bf16.mxu1 %v1006_v0 }
  0xb5   :  { %v151_v12 = vpop.permute.xlu1 %150  ;;  %v145_v13 = vpop.permute.xlu0 %144 }
  0xb6   :  { %v169_v14 = vmul.f32 %v151_v12, %v72_v10  ;;  %v167_v15 = vmul.f32 %v145_v13, %v70_v11 }
  0xb8   :  { %v187_v18 = vrot.slane %v169_v14, 4  ;;  %v175_v19 = vrot.slane %v167_v15, 4 }
  0xb9   :  { %v154_v20 = vpop.permute.xlu1 %153  ;;  %v148_v21 = vpop.permute.xlu0 %147 }
  0xba   :  { %v188_v22 = vadd.f32 %v187_v18, %v169_v14  ;;  %v176_v23 = vadd.f32 %v175_v19, %v167_v15  ;;  %v170_v24 = vmul.f32 %v154_v20, %v73_v16  ;;  %v168_v25 = vmul.f32 %v148_v21, %v71_v17 }
  0xbc   :  { %v189_v26 = vrot.slane %v188_v22, 2  ;;  %v177_v27 = vrot.slane %v176_v23, 2  ;;  %v193_v28 = vrot.slane %v170_v24, 4  ;;  %v181_v29 = vrot.slane %v168_v25, 4 }
  0xbd   :  { %v160_v33 = vpop.permute.xlu1 %159  ;;  %v157_v34 = vpop.permute.xlu0 %156 }
  0xbe   :  { %v178_v35 = vadd.f32 %v177_v27, %v176_v23  ;;  %v194_v36 = vadd.f32 %v193_v28, %v170_v24  ;;  %v182_v37 = vadd.f32 %v181_v29, %v168_v25  ;;  %v172_v38 = vmul.f32 %v160_v33, %v75_v31  ;;  %v437_v23 = vld [vmem:[#allocation6 + $0x8] sm:$0xff]  ;;  %v438_v29 = vld [vmem:[#allocation6 + $0x10] sm:$0xff]  ;;  %v439_v31 = vld [vmem:[#allocation6 + $0x18] sm:$0xff] }
  0xbf   :  { %v171_v39 = vmul.f32 %v157_v34, %v74_v32  ;;  %v190_v40 = vadd.f32 %v189_v26, %v188_v22  ;;  %v436_v22 = vld [vmem:[#allocation6] sm:$0xff]  ;;  %v875_v33 = vpack.c.bf16 %v439_v31, %v438_v29 }
  0xc0   :  { %v195_v41 = vrot.slane %v194_v36, 2  ;;  %v183_v42 = vrot.slane %v182_v37, 2  ;;  %v205_v45 = vrot.slane %v172_v38, 4  ;;  %v179_v49 = vrot.slane %v178_v35, 1  ;;  %v440_v34 = vld [vmem:[#allocation6 + $0x20] sm:$0xff] }
  0xc1   :  { %v199_v46 = vrot.slane %v171_v39, 4  ;;  %v166_v47 = vpop.permute.xlu1 %165  ;;  %v163_v48 = vpop.permute.xlu0 %162  ;;  %v191_v56 = vrot.slane %v190_v40, 1  ;;  %v872_v27 = vpack.c.bf16 %v437_v23, %v436_v22 }
  0xc2   :  { %v196_v50 = vadd.f32 %v195_v41, %v194_v36  ;;  %v184_v51 = vadd.f32 %v183_v42, %v182_v37  ;;  %v206_v52 = vadd.f32 %v205_v45, %v172_v38  ;;  %v174_v54 = vmul.f32 %v166_v47, %v77_v43  ;;  %v442_v37 = vld [vmem:[#allocation6 + $0x30] sm:$0xff]  ;;  %v443_v38 = vld [vmem:[#allocation6 + $0x38] sm:$0xff]  ;;  %v445_v41 = vld [vmem:[#allocation6 + $0x48] sm:$0xff] }
  0xc3   :  { %v200_v53 = vadd.f32 %v199_v46, %v171_v39  ;;  %v173_v55 = vmul.f32 %v163_v48, %v76_v44  ;;  %v180_v62 = vadd.f32 %v179_v49, %v178_v35  ;;  %v192_v6 = vadd.f32 %v191_v56, %v190_v40  ;;  %v441_v35 = vld [vmem:[#allocation6 + $0x28] sm:$0xff]  ;;  %v444_v40 = vld [vmem:[#allocation6 + $0x40] sm:$0xff]  ;;  %v447_v43 = vld [vmem:[#allocation6 + $0x58] sm:$0xff] }
  0xc4   :  { %v185_v57 = vrot.slane %v184_v51, 1  ;;  %v207_v58 = vrot.slane %v206_v52, 2  ;;  %v217_v60 = vrot.slane %v174_v54, 4  ;;  %v197_v63 = vrot.slane %v196_v50, 1  ;;  %v448_v45 = vld [vmem:[#allocation6 + $0x60] sm:$0xff]  ;;  %v449_v46 = vld [vmem:[#allocation6 + $0x68] sm:$0xff] }
  0xc5   :  { %v201_v59 = vrot.slane %v200_v53, 2  ;;  %v211_v61 = vrot.slane %v173_v55, 4  ;;  %v878_v36 = vpack.c.bf16 %v441_v35, %v440_v34  ;;  %v881_v39 = vpack.c.bf16 %v443_v38, %v442_v37  ;;  %v450_v48 = vld [vmem:[#allocation6 + $0x70] sm:$0xff]  ;;  %v451_v49 = vld [vmem:[#allocation6 + $0x78] sm:$0xff] }
  0xc6   :  { %v186_v1 = vadd.f32 %v185_v57, %v184_v51  ;;  %v208_v2 = vadd.f32 %v207_v58, %v206_v52  ;;  %v218_v4 = vadd.f32 %v217_v60, %v174_v54  ;;  %v198_v12 = vadd.f32 %v197_v63, %v196_v50  ;;  %v434_v51 = vld [vmem:[#allocation4 + $0x70] sm:$0xff]  ;;  %v435_v52 = vld [vmem:[#allocation4 + $0x78] sm:$0xff] }
  0xc7   :  { %v202_v3 = vadd.f32 %v201_v59, %v200_v53  ;;  %v212_v5 = vadd.f32 %v211_v61, %v173_v55  ;;  %v884_v42 = vpack.c.bf16 %v445_v41, %v444_v40  ;;  %v890_v47 = vpack.c.bf16 %v449_v46, %v448_v45 }
  0xc8   :  { %v248_v7 = vsel %vm247_vm2, %v186_v1, %v180_v62  ;;  %v209_v8 = vrot.slane %v208_v2, 1  ;;  %v219_v10 = vrot.slane %v218_v4, 2  ;;  %v893_v50 = vpack.c.bf16 %v451_v49, %v450_v48  ;;  %v613_v62 = vld [vmem:[%s1266_s7] ss:$0 sm:$0xff] }
  0xc9   :  { %v203_v9 = vrot.slane %v202_v3, 1  ;;  %v213_v11 = vrot.slane %v212_v5, 2  ;;  %v250_v13 = vsel %vm249_vm3, %v192_v6, %v248_v7  ;;  %v917_v53 = vpack.c.bf16 %v435_v52, %v434_v51 }
  0xca   :  { %v220_v15 = vadd.f32 %v219_v10, %v218_v4  ;;  %v210_v17 = vadd.f32 %v209_v8, %v208_v2  ;;  %v252_v18 = vsel %vm251_vm4, %v198_v12, %v250_v13 }
  0xcb   :  { %v204_v14 = vadd.f32 %v203_v9, %v202_v3  ;;  %v214_v16 = vadd.f32 %v213_v11, %v212_v5  ;;  %918 = vmatpush3.bf16.msra.mxu1 %v917_v53 }
  0xcc   :  { %v221_v19 = vrot.slane %v220_v15, 1 }
  0xcd   :  { %v215_v20 = vrot.slane %v214_v16, 1  ;;  %v254_v21 = vsel %vm253_vm5, %v204_v14, %v252_v18 }
  0xce   :  { %v222_v25 = vadd.f32 %v221_v19, %v220_v15  ;;  %v256_v26 = vsel %vm255_vm6, %v210_v17, %v254_v21 }
  0xcf   :  { %v216_v24 = vadd.f32 %v215_v20, %v214_v16 }
  0xd1   :  { %v258_v28 = vsel %vm257_vm7, %v216_v24, %v256_v26 }
  0xd2   :  { %v260_v32 = vsel %vm259_vm8, %v222_v25, %v258_v28 }
  0xd3   :  { %716 = vmatmul.mubr.f32.vlgmr.msra.gmra.mrb[0].mxu0 %v260_v32 }
  0xd4   :  { %873 = vmatpush3.bf16.msra.mxu0 %v872_v27  ;;  %785 = vmatprep.mubr.msk.f32.mxu0 %vm1007_vm1, %v1008_v30  ;;  %v446_v30 = vld [vmem:[#allocation6 + $0x50] sm:$0xff] }
  0xd5   :  { %874 = vmatprep.subr.bf16.mxu0 %v1006_v0  ;;  %v887_v44 = vpack.c.bf16 %v447_v43, %v446_v30 }
  0xd8   :  { %876 = vmatpush3.bf16.msra.mxu0 %v875_v33 }
  0xd9   :  { %877 = vmatprep.subr.bf16.mxu0 %v1006_v0 }
  0xdc   :  { %879 = vmatpush3.bf16.msra.mxu0 %v878_v36 }
  0xdd   :  { %880 = vmatprep.subr.bf16.mxu0 %v1006_v0 }
  0xe0   :  { %882 = vmatpush3.bf16.msra.mxu0 %v881_v39 }
  0xe1   :  { %883 = vmatprep.subr.bf16.mxu0 %v1006_v0 }
  0xe4   :  { %885 = vmatpush3.bf16.msra.mxu0 %v884_v42 }
  0xe5   :  { %886 = vmatprep.subr.bf16.mxu0 %v1006_v0 }
  0xe8   :  { %888 = vmatpush3.bf16.msra.mxu0 %v887_v44 }
  0xe9   :  { %889 = vmatprep.subr.bf16.mxu0 %v1006_v0 }
  0xec   :  { %891 = vmatpush3.bf16.msra.mxu0 %v890_v47 }
  0xed   :  { %892 = vmatprep.subr.bf16.mxu0 %v1006_v0 }
  0xf0   :  { %894 = vmatpush3.bf16.msra.mxu0 %v893_v50 }
 0x137   :  { %v416_v54 = vpop.f32.mrb[0].mxu1 }
 0x138   :  { %v752_v55 = vpop.f32.mrb[1].mxu1  ;;  %786 = vmatmul.mubr.f32.vlgmr.msra.gmra.mrb[2].mxu0 %v416_v54 }
 0x1a6   :  { %v328_v56 = vpop.f32.mrb[0].mxu0 }
 0x1a7   :  { %v332_v57 = vmul.f32 0.125, %v328_v56  ;;  %v717_v58 = vpop.f32.mrb[1].mxu0 }
 0x1a9   :  { %821 = vmatmul.mubr.f32.vlgmr.msra.gmra.mrb[2].mxu1 %v332_v57 }
 0x20b   :  { %v518_v59 = vpop.f32.mrb[2].mxu0 }
 0x20c   :  { %v787_v60 = vpop.f32.mrb[3].mxu0 }
 0x27c   :  { %v588_v61 = vpop.f32.mrb[2].mxu1 }
 0x27d   :  { %v589_v0 = vadd.f32 %v588_v61, %v518_v59  ;;  %v822_v63 = vpop.f32.mrb[3].mxu1 }
 0x27f   :  { %v599_v1 = vadd.f32 %v613_v62, %v589_v0 }
 0x281   :  { %v614_v2 = vmul.f32 -1.442695, %v599_v1 }
 0x283   :  { %927 = vpow2.f32 %v614_v2 }
 0x28d   :  { %v928_v3 = vpop.eup %927 }
 0x28e   :  { %v603_v4 = vadd.f32 1.0, %v928_v3 }
 0x290   :  { %929 = vrcp.f32 %v603_v4 }
 0x29a   :  { %v930_v5 = vpop.eup %929 }
 0x29b   :  { %606 = vst [vmem:[%s1267_s8] sm:$0xff] %v930_v5 }
 0x29c   :  { %611 = vsyncpa [#allocation3], 1 }
 0x29d   :  { %612 = vsyncpa [#allocation5], 1 }

</bundles_post_ra>
